<compile_context>
chip_gen: v5e
topology: v5e:2x2
jax: 0.10.0
libtpu: 0.0.40
codegen_flags: <defaults>
</compile_context>

<pallas_src>
import functools

import jax
import jax.numpy as jnp
from jax.experimental import pallas as pl
from jax.experimental.pallas import tpu as pltpu


def _colormodel_kernel(patches_ref, w_patch_ref, b_patch_ref,
                       w_head_ref, b_head_ref, out_ref, *, tile_n, p, d_emb):
    # ---- synthetic feature extractor (patch embed + ReLU + token pool) ----
    # bf16 MXU operands, f32 accumulation.
    tok = jnp.dot(patches_ref[...], w_patch_ref[...],
                  preferred_element_type=jnp.float32)           # (tile_n*P, D) f32
    tok = jnp.maximum(tok + b_patch_ref[...], 0.0)              # bias + ReLU in f32

    # Token SUM over the P patches of each image; the 1/P mean scale is folded
    # into w_head in the wrapper. D stays the last (lane) dim, no relayout.
    feats = tok.reshape(tile_n, p, -1).sum(axis=1)              # (tile_n, D) f32

    # ---- fused Classifier head: [emb (128 lanes) | reg (128 replicated lanes)] ----
    head = jnp.dot(feats.astype(w_head_ref.dtype), w_head_ref[...],
                   preferred_element_type=jnp.float32)          # (tile_n, 256) f32
    head = head + b_head_ref[...]

    # L2-normalize only the embedding half. Both the slice and the two stores
    # sit on 128-lane tile boundaries -> unmasked vst, no mask/where/iota.
    emb = head[:, :d_emb]
    sumsq = jnp.sum(emb * emb, axis=1, keepdims=True)
    eps = jnp.float32(1e-12)
    inv = jax.lax.rsqrt(jnp.maximum(sumsq, eps * eps))          # 1 / max(||emb||, eps)
    out_ref[:, :d_emb] = emb * inv
    out_ref[:, d_emb:] = head[:, d_emb:]


def _choose_tile_n(n, requested):
    """Pick a batch tile: multiple of 8, large by default, ~2 grid steps for small N."""
    requested = max(8, (requested // 8) * 8)
    if n >= 2 * requested:
        return requested
    # Small batches: aim for ~2 grid steps (v7x megacore), rounded to a multiple of 8.
    t = (((n + 1) // 2 + 7) // 8) * 8
    return min(max(8, t), requested)


def color_model_forward(x, params, *, tile_n=128):
    """x: (N, 3, H, W) float32 NCHW. Returns (regression (N,1), embedding (N,128))."""
    n, c, h, w = x.shape
    ph = pw = 4                      # patch size (stride == kernel -> im2col is exact conv)
    gh, gw = h // ph, w // pw
    p = gh * gw                      # tokens per image
    k = c * ph * pw

    w_patch, b_patch, w_cls, b_cls, w_emb, b_emb = params
    d = w_patch.shape[1]
    d_emb = w_emb.shape[1]           # 128
    head_width = d_emb + 128         # 256 lanes: [emb | reg replicated across 128 lanes]

    # Fuse the (D,1) regression weight into the embedding weight (lane-dense head)
    # and fold the 1/P mean-pool scale into the bf16 head weight.
    w_head = (jnp.concatenate([w_emb, jnp.broadcast_to(w_cls, (d, 128))], axis=1)
              * (1.0 / p)).astype(jnp.bfloat16)
    b_head = jnp.concatenate(
        [b_emb, jnp.broadcast_to(b_cls, (1, 128))], axis=1).astype(jnp.float32)
    w_patch_b = w_patch.astype(jnp.bfloat16)
    b_patch_f = b_patch.astype(jnp.float32)

    # im2col glue in plain JAX; matmul operands cast to bf16 (f32 accumulation in-kernel).
    patches = (x.reshape(n, c, gh, ph, gw, pw)
                 .transpose(0, 2, 4, 1, 3, 5)
                 .reshape(n * p, k)).astype(jnp.bfloat16)

    # Batch tiling: pad N up to a multiple of tile_n (never a single huge block).
    tile_n = _choose_tile_n(n, tile_n)
    n_pad = pl.cdiv(n, tile_n) * tile_n
    if n_pad != n:
        patches = jnp.pad(patches, ((0, (n_pad - n) * p), (0, 0)))
    grid = (n_pad // tile_n,)

    kernel = functools.partial(_colormodel_kernel, tile_n=tile_n, p=p, d_emb=d_emb)
    # Whole-array, VMEM-resident operands: no double-buffering for constants.
    resident = pl.BlockSpec(memory_space=pltpu.MemorySpace.VMEM)

    out = pl.pallas_call(
        kernel,
        out_shape=jax.ShapeDtypeStruct((n_pad, head_width), jnp.float32),
        grid=grid,
        in_specs=[
            pl.BlockSpec((tile_n * p, k), lambda i: (i, 0)),   # patches: batch-tiled, pipelined
            resident,                                          # w_patch
            resident,                                          # b_patch
            resident,                                          # w_head (fused, scaled)
            resident,                                          # b_head (fused)
        ],
        out_specs=pl.BlockSpec((tile_n, head_width), lambda i: (i, 0)),
        compiler_params=pltpu.CompilerParams(
            dimension_semantics=("parallel",),                 # megacore sharding on v7x
            vmem_limit_bytes=32 * 1024 * 1024),
    )(patches, w_patch_b, b_patch_f, w_head, b_head)

    emb = out[:n, :d_emb]
    reg = out[:n, d_emb:d_emb + 1]
    return reg, emb


def init_params(key, k=48, d=128):
    ks = jax.random.split(key, 6)
    w_patch = jax.random.normal(ks[0], (k, d), jnp.float32) * 0.05
    b_patch = jax.random.normal(ks[1], (1, d), jnp.float32) * 0.01
    w_cls   = jax.random.normal(ks[2], (d, 1), jnp.float32) * 0.05
    b_cls   = jax.random.normal(ks[3], (1, 1), jnp.float32) * 0.01
    w_emb   = jax.random.normal(ks[4], (d, 128), jnp.float32) * 0.05
    b_emb   = jax.random.normal(ks[5], (1, 128), jnp.float32) * 0.01
    return (w_patch, b_patch, w_cls, b_cls, w_emb, b_emb)


def _reference(x, params):
    # pure-JAX f32 reference of the same forward (for a sanity check)
    n, c, h, w = x.shape
    ph = pw = 4
    gh, gw = h // ph, w // pw
    p = gh * gw
    patches = (x.reshape(n, c, gh, ph, gw, pw)
                 .transpose(0, 2, 4, 1, 3, 5)
                 .reshape(n * p, c * ph * pw))
    w_patch, b_patch, w_cls, b_cls, w_emb, b_emb = params
    tok = jnp.maximum(patches @ w_patch + b_patch, 0.0)
    feats = tok.reshape(n, p, -1).mean(axis=1)
    reg = feats @ w_cls + b_cls
    emb = feats @ w_emb + b_emb
    emb = emb / jnp.maximum(jnp.sqrt(jnp.sum(emb * emb, axis=1, keepdims=True)), 1e-12)
    return reg, emb


if __name__ == "__main__":
    key = jax.random.PRNGKey(0)
    kx, kx2, kp = jax.random.split(key, 3)

    params = init_params(kp, k=3 * 4 * 4, d=128)
    fwd = jax.jit(color_model_forward)

    # small shapes consistent with the module: NCHW image input, 3 channels
    x = jax.random.normal(kx, (2, 3, 16, 16), jnp.float32)
    reg, emb = fwd(x, params)
    jax.block_until_ready((reg, emb))

    reg_ref, emb_ref = _reference(x, params)
    assert reg.shape == (2, 1) and emb.shape == (2, 128)
    # bf16 MXU operands (f32 accumulation) -> loosened tolerance vs. f32 reference.
    assert jnp.allclose(reg, reg_ref, atol=2e-2, rtol=2e-2)
    assert jnp.allclose(emb, emb_ref, atol=2e-2, rtol=2e-2)

    # exercise the padded, multi-grid-step path (N not a multiple of the tile)
    x2 = jax.random.normal(kx2, (20, 3, 16, 16), jnp.float32)
    reg2, emb2 = fwd(x2, params)
    jax.block_until_ready((reg2, emb2))
    reg2_ref, emb2_ref = _reference(x2, params)
    assert reg2.shape == (20, 1) and emb2.shape == (20, 128)
    assert jnp.allclose(reg2, reg2_ref, atol=2e-2, rtol=2e-2)
    assert jnp.allclose(emb2, emb2_ref, atol=2e-2, rtol=2e-2)

    print("KERNEL_OK")
</pallas_src>

<mosaic_0001>
module attributes {stable_mosaic.version = 11 : i64} {
  func.func @_colormodel_kernel(%arg0: i32, %arg1: memref<128x48xbf16, #tpu.memory_space<vmem>>, %arg2: memref<48x128xbf16, #tpu.memory_space<vmem>>, %arg3: memref<1x128xf32, #tpu.memory_space<vmem>>, %arg4: memref<128x256xbf16, #tpu.memory_space<vmem>>, %arg5: memref<1x256xf32, #tpu.memory_space<vmem>>, %arg6: memref<8x256xf32, #tpu.memory_space<vmem>>) attributes {dimension_semantics = [#tpu.dimension_semantics<parallel>], iteration_bounds = array<i64: 1>, scalar_prefetch = 0 : i64, scratch_operands = 0 : i64, tpu.core_type = #tpu.core_type<tc>, window_params = [{transform_indices = @transform_0, window_bounds = array<i64: 128, 48>}, {pipeline_mode = #tpu.pipeline_mode<synchronous>, transform_indices = @transform_1, window_bounds = array<i64: 48, 128>}, {pipeline_mode = #tpu.pipeline_mode<synchronous>, transform_indices = @transform_2, window_bounds = array<i64: 1, 128>}, {pipeline_mode = #tpu.pipeline_mode<synchronous>, transform_indices = @transform_3, window_bounds = array<i64: 128, 256>}, {pipeline_mode = #tpu.pipeline_mode<synchronous>, transform_indices = @transform_4, window_bounds = array<i64: 1, 256>}, {transform_indices = @transform_5, window_bounds = array<i64: 8, 256>}]} {
    %c0 = arith.constant 0 : index
    %c0_0 = arith.constant 0 : index
    %0 = vector.load %arg1[%c0, %c0_0] : memref<128x48xbf16, #tpu.memory_space<vmem>>, vector<128x48xbf16>
    %c0_1 = arith.constant 0 : index
    %c0_2 = arith.constant 0 : index
    %1 = vector.load %arg2[%c0_1, %c0_2] : memref<48x128xbf16, #tpu.memory_space<vmem>>, vector<48x128xbf16>
    %cst = arith.constant dense<0.000000e+00> : vector<128x128xf32>
    %2 = tpu.matmul %0, %1, %cst {dimension_numbers = #tpu.dot_dimension_numbers<[1], [0], [0], [1], [0, 0, 1, 1], [], []>} : vector<128x48xbf16>, vector<48x128xbf16>, vector<128x128xf32> -> vector<128x128xf32>
    %c0_3 = arith.constant 0 : index
    %c0_4 = arith.constant 0 : index
    %3 = vector.load %arg3[%c0_3, %c0_4] : memref<1x128xf32, #tpu.memory_space<vmem>>, vector<1x128xf32>
    %4 = vector.broadcast %3 : vector<1x128xf32> to vector<128x128xf32>
    %5 = arith.addf %2, %4 : vector<128x128xf32>
    %cst_5 = arith.constant 0.000000e+00 : f32
    %6 = vector.broadcast %cst_5 : f32 to vector<128x128xf32>
    %7 = arith.maximumf %5, %6 : vector<128x128xf32>
    %8 = vector.shape_cast %7 : vector<128x128xf32> to vector<8x16x128xf32>
    %cst_6 = arith.constant dense<0.000000e+00> : vector<8x128xf32>
    %9 = vector.multi_reduction <add>, %8, %cst_6 [1] : vector<8x16x128xf32> to vector<8x128xf32>
    %10 = arith.truncf %9 : vector<8x128xf32> to vector<8x128xbf16>
    %c0_7 = arith.constant 0 : index
    %c0_8 = arith.constant 0 : index
    %11 = vector.load %arg4[%c0_7, %c0_8] : memref<128x256xbf16, #tpu.memory_space<vmem>>, vector<128x256xbf16>
    %cst_9 = arith.constant dense<0.000000e+00> : vector<8x256xf32>
    %12 = tpu.matmul %10, %11, %cst_9 {dimension_numbers = #tpu.dot_dimension_numbers<[1], [0], [0], [1], [0, 0, 1, 1], [], []>} : vector<8x128xbf16>, vector<128x256xbf16>, vector<8x256xf32> -> vector<8x256xf32>
    %c0_10 = arith.constant 0 : index
    %c0_11 = arith.constant 0 : index
    %13 = vector.load %arg5[%c0_10, %c0_11] : memref<1x256xf32, #tpu.memory_space<vmem>>, vector<1x256xf32>
    %14 = vector.broadcast %13 : vector<1x256xf32> to vector<8x256xf32>
    %15 = arith.addf %12, %14 : vector<8x256xf32>
    %16 = vector.extract_strided_slice %15 {offsets = [0, 0], sizes = [8, 128], strides = [1, 1]} : vector<8x256xf32> to vector<8x128xf32>
    %17 = arith.mulf %16, %16 : vector<8x128xf32>
    %cst_12 = arith.constant dense<0.000000e+00> : vector<8xf32>
    %18 = vector.multi_reduction <add>, %17, %cst_12 [1] : vector<8x128xf32> to vector<8xf32>
    %19 = vector.shape_cast %18 : vector<8xf32> to vector<8x1xf32>
    %cst_13 = arith.constant 9.99999996E-13 : f32
    %cst_14 = arith.constant 9.99999996E-13 : f32
    %20 = arith.mulf %cst_13, %cst_14 : f32
    %21 = vector.broadcast %20 : f32 to vector<8x1xf32>
    %22 = arith.maximumf %19, %21 : vector<8x1xf32>
    %23 = math.rsqrt %22 : vector<8x1xf32>
    %24 = vector.broadcast %23 : vector<8x1xf32> to vector<8x128xf32>
    %25 = arith.mulf %16, %24 : vector<8x128xf32>
    %c0_15 = arith.constant 0 : index
    %c0_16 = arith.constant 0 : index
    %26 = vector.load %arg6[%c0_15, %c0_16] : memref<8x256xf32, #tpu.memory_space<vmem>>, vector<8x128xf32>
    tpu.vector_store %arg6[%c0_15, %c0_16], %25 {strides = array<i32>} : memref<8x256xf32, #tpu.memory_space<vmem>>, vector<8x128xf32>,
    %27 = vector.extract_strided_slice %15 {offsets = [0, 128], sizes = [8, 128], strides = [1, 1]} : vector<8x256xf32> to vector<8x128xf32>
    %c0_17 = arith.constant 0 : index
    %c128 = arith.constant 128 : index
    %28 = vector.load %arg6[%c0_17, %c128] : memref<8x256xf32, #tpu.memory_space<vmem>>, vector<8x128xf32>
    tpu.vector_store %arg6[%c0_17, %c128], %27 {strides = array<i32>} : memref<8x256xf32, #tpu.memory_space<vmem>>, vector<8x128xf32>,
    return
  }
  func.func @transform_0(%arg0: i32) -> (i32, i32) {
    %c0_i32 = arith.constant 0 : i32
    %c0_i32_0 = arith.constant 0 : i32
    return %arg0, %c0_i32 : i32, i32
  }
  func.func @transform_1(%arg0: i32) -> (i32, i32) {
    %c0_i32 = arith.constant 0 : i32
    %c0_i32_0 = arith.constant 0 : i32
    %c0_i32_1 = arith.constant 0 : i32
    return %c0_i32, %c0_i32_0 : i32, i32
  }
  func.func @transform_2(%arg0: i32) -> (i32, i32) {
    %c0_i32 = arith.constant 0 : i32
    %c0_i32_0 = arith.constant 0 : i32
    %c0_i32_1 = arith.constant 0 : i32
    return %c0_i32, %c0_i32_0 : i32, i32
  }
  func.func @transform_3(%arg0: i32) -> (i32, i32) {
    %c0_i32 = arith.constant 0 : i32
    %c0_i32_0 = arith.constant 0 : i32
    %c0_i32_1 = arith.constant 0 : i32
    return %c0_i32, %c0_i32_0 : i32, i32
  }
  func.func @transform_4(%arg0: i32) -> (i32, i32) {
    %c0_i32 = arith.constant 0 : i32
    %c0_i32_0 = arith.constant 0 : i32
    %c0_i32_1 = arith.constant 0 : i32
    return %c0_i32, %c0_i32_0 : i32, i32
  }
  func.func @transform_5(%arg0: i32) -> (i32, i32) {
    %c0_i32 = arith.constant 0 : i32
    %c0_i32_0 = arith.constant 0 : i32
    return %arg0, %c0_i32 : i32, i32
  }
}

</mosaic_0001>

<bundles_post_ra>
// kernel: color_model_forward.1
= control target key start
LH: loop header
LB: loop body
LE: loop exit
PB: predicated region body
PF: predicated region fallthrough
CT: control target
= control target key end

     0   :  { %vm105_vm0 = vcmask 392192   ;;  %vm297_vm1 = vcmask 1041409   ;;  %vm299_vm2 = vcmask 1042434   ;;  %vm301_vm3 = vcmask 1043459   ;;  %s778_s1 = inlined_call_operand.vmem [shape: bf16[48,128], index: 1, kind: input, shape index: {}]   ;;  %s779_s2 = inlined_call_operand.vmem [shape: f32[1,128], index: 2, kind: input, shape index: {}]   ;;  %s780_s0 = inlined_call_operand.vmem [shape: bf16[128,48], index: 0, kind: input, shape index: {}]   ;;  %s781_s3 = inlined_call_operand.vmem [shape: bf16[128,256], index: 3, kind: input, shape index: {}]   ;;  %s782_s4 = inlined_call_operand.vmem [shape: f32[1,256], index: 4, kind: input, shape index: {}]   ;;  %s783_s5 = inlined_call_operand.vmem [shape: f32[8,256], index: 5, kind: output, shape index: {}]  }
   0x1   :  { %v566_v0 = vld [vmem:[%s778_s1 + $0x10] sm:$0xff]  ;;  %v565_v1 = vld [vmem:[%s778_s1 + $0x8] sm:$0xff]  ;;  %v564_v2 = vld [vmem:[%s778_s1] sm:$0xff]  ;;  %vm303_vm4 = vcmask 1044484   ;;  %vm305_vm5 = vcmask 1045509   ;;  %vm307_vm6 = vcmask 1046534  }
   0x2   :  { %135 = vmatpush.bf16.msra.mxu0 %v566_v0  ;;  %583 = vmatpush.bf16.msra.mxu3 %v566_v0  ;;  %v556_v3 = vld [vmem:[%s780_s0] sm:$0xff]  ;;  %v557_v5 = vld [vmem:[%s780_s0 + $0x8] sm:$0xff]  ;;  %v558_v7 = vld [vmem:[%s780_s0 + $0x10] sm:$0xff]  ;;  %vm309_vm7 = vcmask 1047559  }
   0x3   :  { %v560_v4 = vld [vmem:[%s780_s0 + $0x20] sm:$0xff]  ;;  %v561_v6 = vld [vmem:[%s780_s0 + $0x28] sm:$0xff]  ;;  %v562_v8 = vld [vmem:[%s780_s0 + $0x30] sm:$0xff] }
   0x4   :  { %v559_v9 = vld [vmem:[%s780_s0 + $0x18] sm:$0xff]  ;;  %v550_v17 = vld [vmem:[%s781_s3 + $0x70] sm:$0xf]  ;;  %v581_v19 = vld [vmem:[%s781_s3 + $0x74] sm:$0xf] }
   0x5   :  { %v563_v10 = vld [vmem:[%s780_s0 + $0x38] sm:$0xff]  ;;  %v542_v24 = vld [vmem:[%s781_s3 + $0x60] sm:$0xf]  ;;  %v580_v25 = vld [vmem:[%s781_s3 + $0x64] sm:$0xf0] }
   0x6   :  { %136 = vmatpush.bf16.msra.mxu0 %v565_v1  ;;  %584 = vmatpush.bf16.msra.mxu3 %v565_v1  ;;  %v582_v18 = vld [vmem:[%s781_s3 + $0x74] sm:$0xf0]  ;;  %v552_v21 = vld [vmem:[%s781_s3 + $0x78] sm:$0xf0]  ;;  %v579_v26 = vld [vmem:[%s781_s3 + $0x64] sm:$0xf]  ;;  %v543_v27 = vor.u32 %v580_v25, %v542_v24 }
   0x7   :  { %v551_v20 = vor.u32 %v582_v18, %v550_v17  ;;  %v555_v23 = vor.u32 %v581_v19, %v552_v21  ;;  %v544_v28 = vld [vmem:[%s781_s3 + $0x68] sm:$0xf0]  ;;  %v679_v30 = vld [vmem:[%s779_s2] ss:$0 sm:$0xff]  ;;  %v534_v32 = vld [vmem:[%s781_s3 + $0x50] sm:$0xf] }
   0x8   :  { %v547_v29 = vor.u32 %v579_v26, %v544_v28  ;;  %v578_v33 = vld [vmem:[%s781_s3 + $0x54] sm:$0xf0]  ;;  %v577_v34 = vld [vmem:[%s781_s3 + $0x54] sm:$0xf]  ;;  %v536_v36 = vld [vmem:[%s781_s3 + $0x58] sm:$0xf0] }
   0x9   :  { %393 = vmatpush.bf16.msra.mxu1 %v551_v20  ;;  %406 = vmatpush.bf16.msra.mxu2 %v555_v23  ;;  %v535_v35 = vor.u32 %v578_v33, %v534_v32  ;;  %v539_v39 = vor.u32 %v577_v34, %v536_v36  ;;  %v526_v42 = vld [vmem:[%s781_s3 + $0x40] sm:$0xf]  ;;  %v576_v43 = vld [vmem:[%s781_s3 + $0x44] sm:$0xf0]  ;;  %v575_v44 = vld [vmem:[%s781_s3 + $0x44] sm:$0xf] }
   0xa   :  { %137 = vmatpush.bf16.msra.mxu0 %v564_v2  ;;  %585 = vmatpush.bf16.msra.mxu3 %v564_v2  ;;  %v528_v46 = vld [vmem:[%s781_s3 + $0x48] sm:$0xf0]  ;;  %v527_v48 = vor.u32 %v576_v43, %v526_v42  ;;  %v518_v54 = vld [vmem:[%s781_s3 + $0x30] sm:$0xf]  ;;  %v574_v55 = vld [vmem:[%s781_s3 + $0x34] sm:$0xf0] }
   0xb   :  { %v531_v49 = vor.u32 %v575_v44, %v528_v46  ;;  %v573_v56 = vld [vmem:[%s781_s3 + $0x34] sm:$0xf]  ;;  %v519_v60 = vor.u32 %v574_v55, %v518_v54  ;;  %v520_v61 = vld [vmem:[%s781_s3 + $0x38] sm:$0xf0]  ;;  %v502_v21 = vld [vmem:[%s781_s3 + $0x10] sm:$0xf] }
   0xc   :  { %v523_v1 = vor.u32 %v573_v56, %v520_v61  ;;  %v569_v26 = vld [vmem:[%s781_s3 + $0x14] sm:$0xf]  ;;  %v494_v28 = vld [vmem:[%s781_s3] sm:$0xf]  ;;  %v568_v33 = vld [vmem:[%s781_s3 + $0x4] sm:$0xf0] }
   0xd   :  { %484 = vmatmul.msk.bf16.vlgmr.msra.gmra.mxu0 %vm105_vm0, %v556_v3  ;;  %488 = vmatmul.msk.bf16.vlgmr.msra.gmra.mxu3 %vm105_vm0, %v560_v4  ;;  %v567_v34 = vld [vmem:[%s781_s3 + $0x4] sm:$0xf]  ;;  %v495_v44 = vor.u32 %v568_v33, %v494_v28 }
   0xe   :  { %394 = vmatpush.bf16.msra.mxu1 %v543_v27  ;;  %407 = vmatpush.bf16.msra.mxu2 %v547_v29  ;;  %v504_v27 = vld [vmem:[%s781_s3 + $0x18] sm:$0xf0] }
   0xf   :  { %v507_v36 = vor.u32 %v569_v26, %v504_v27 }
  0x12   :  { %395 = vmatpush.bf16.msra.mxu1 %v535_v35  ;;  %408 = vmatpush.bf16.msra.mxu2 %v539_v39 }
  0x16   :  { %396 = vmatpush.bf16.msra.mxu1 %v527_v48  ;;  %409 = vmatpush.bf16.msra.mxu2 %v531_v49 }
  0x1a   :  { %397 = vmatpush.bf16.msra.mxu1 %v519_v60  ;;  %410 = vmatpush.bf16.msra.mxu2 %v523_v1 }
  0x1d   :  { %485 = vmatmul.msk.bf16.gmra.mxu0 %vm105_vm0, %v557_v5  ;;  %489 = vmatmul.msk.bf16.gmra.mxu3 %vm105_vm0, %v561_v6  ;;  %v510_v6 = vld [vmem:[%s781_s3 + $0x20] sm:$0xf] }
  0x2d   :  { %486 = vmatmul.msk.bf16.gmra.mxu0 %vm105_vm0, %v558_v7  ;;  %490 = vmatmul.msk.bf16.gmra.mxu3 %vm105_vm0, %v562_v8  ;;  %v572_v7 = vld [vmem:[%s781_s3 + $0x24] sm:$0xf0]  ;;  %v571_v8 = vld [vmem:[%s781_s3 + $0x24] sm:$0xf] }
  0x3d   :  { %487 = vmatmul.msk.bf16.gmra.mxu0 %vm105_vm0, %v559_v9  ;;  %491 = vmatmul.msk.bf16.gmra.mxu3 %vm105_vm0, %v563_v10 }
  0x8a   :  { %v139_v11 = vpop.f32.mrf.mxu0 }
  0x8b   :  { %v140_v40 = vadd.f32 %v679_v30, %v139_v11 }
  0x8d   :  { %v179_v50 = vmax.f32 %v140_v40, 0.0 }
  0x90   :  { %v159_v12 = vpop.f32.mrf.mxu3 }
  0x91   :  { %v160_v62 = vadd.f32 %v679_v30, %v159_v12  ;;  %v511_v12 = vor.u32 %v572_v7, %v510_v6 }
  0x92   :  { %v141_v13 = vpop.f32.mrf.mxu0 }
  0x93   :  { %v142_v37 = vadd.f32 %v679_v30, %v141_v13  ;;  %v512_v13 = vld [vmem:[%s781_s3 + $0x28] sm:$0xf0]  ;;  %398 = vmatpush.bf16.msra.mxu1 %v511_v12 }
  0x95   :  { %v180_v47 = vmax.f32 %v142_v37, 0.0  ;;  %v496_v37 = vld [vmem:[%s781_s3 + $0x8] sm:$0xf0] }
  0x97   :  { %v195_v63 = vadd.f32 %v180_v47, %v179_v50 }
  0x98   :  { %v161_v14 = vpop.f32.mrf.mxu3 }
  0x99   :  { %v162_v51 = vadd.f32 %v679_v30, %v161_v14  ;;  %v187_v14 = vmax.f32 %v160_v62, 0.0 }
  0x9a   :  { %v144_v15 = vpop.f32.mrf.mxu0 }
  0x9b   :  { %v145_v45 = vadd.f32 %v679_v30, %v144_v15  ;;  %v188_v2 = vmax.f32 %v162_v51, 0.0  ;;  %v196_v15 = vrot.slane %v195_v63, 4 }
  0x9d   :  { %v181_v57 = vmax.f32 %v145_v45, 0.0  ;;  %v223_v23 = vadd.f32 %v188_v2, %v187_v14  ;;  %v499_v45 = vor.u32 %v567_v34, %v496_v37 }
  0x9f   :  { %v224_v42 = vrot.slane %v223_v23, 4 }
  0xa0   :  { %v164_v16 = vpop.f32.mrf.mxu3 }
  0xa1   :  { %v165_v3 = vadd.f32 %v679_v30, %v164_v16  ;;  %v515_v16 = vor.u32 %v571_v8, %v512_v13  ;;  %v225_v50 = vadd.f32 %v224_v42, %v223_v23 }
  0xa2   :  { %v146_v22 = vpop.f32.mrf.mxu0 }
  0xa3   :  { %v147_v41 = vadd.f32 %v679_v30, %v146_v22  ;;  %v189_v17 = vmax.f32 %v165_v3, 0.0  ;;  %v570_v22 = vld [vmem:[%s781_s3 + $0x14] sm:$0xf0]  ;;  %411 = vmatpush.bf16.msra.mxu2 %v515_v16  ;;  %v226_v60 = vrot.slane %v225_v50, 2 }
  0xa4   :  { %v503_v25 = vor.u32 %v570_v22, %v502_v21 }
  0xa5   :  { %v182_v52 = vmax.f32 %v147_v41, 0.0  ;;  %v227_v6 = vadd.f32 %v226_v60, %v225_v50 }
  0xa6   :  { %399 = vmatpush.bf16.msra.mxu1 %v503_v25 }
  0xa7   :  { %v202_v4 = vadd.f32 %v182_v52, %v181_v57  ;;  %412 = vmatpush.bf16.msra.mxu2 %v507_v36 }
  0xa8   :  { %v166_v31 = vpop.f32.mrf.mxu3 }
  0xa9   :  { %v167_v58 = vadd.f32 %v679_v30, %v166_v31  ;;  %v203_v18 = vrot.slane %v202_v4, 4 }
  0xaa   :  { %v149_v38 = vpop.f32.mrf.mxu0  ;;  %400 = vmatpush.bf16.msra.mxu1 %v495_v44 }
  0xab   :  { %v150_v59 = vadd.f32 %v679_v30, %v149_v38  ;;  %v190_v9 = vmax.f32 %v167_v58, 0.0  ;;  %v197_v38 = vadd.f32 %v196_v15, %v195_v63  ;;  %v204_v39 = vadd.f32 %v203_v18, %v202_v4  ;;  %413 = vmatpush.bf16.msra.mxu2 %v499_v45 }
  0xac   :  { %v228_v18 = vrot.slane %v227_v6, 1 }
  0xad   :  { %v183_v10 = vmax.f32 %v150_v59, 0.0  ;;  %v230_v29 = vadd.f32 %v190_v9, %v189_v17  ;;  %v205_v48 = vrot.slane %v204_v39, 2  ;;  %v198_v49 = vrot.slane %v197_v38, 2 }
  0xae   :  { %v229_v28 = vadd.f32 %v228_v18, %v227_v6 }
  0xaf   :  { %v231_v46 = vrot.slane %v230_v29, 4  ;;  %v206_v57 = vadd.f32 %v205_v48, %v204_v39  ;;  %v199_v59 = vadd.f32 %v198_v49, %v197_v38 }
  0xb0   :  { %v169_v53 = vpop.f32.mrf.mxu3  ;;  %v255_v38 = vpack.c.bf16 %v229_v28, %v229_v28 }
  0xb1   :  { %v170_v19 = vadd.f32 %v679_v30, %v169_v53  ;;  %v232_v54 = vadd.f32 %v231_v46, %v230_v29  ;;  %v207_v2 = vrot.slane %v206_v57, 1 }
  0xb2   :  { %v151_v0 = vpop.f32.mrf.mxu0 }
  0xb3   :  { %v152_v5 = vadd.f32 %v679_v30, %v151_v0  ;;  %v191_v40 = vmax.f32 %v170_v19, 0.0  ;;  %v233_v63 = vrot.slane %v232_v54, 2  ;;  %v208_v13 = vadd.f32 %v207_v2, %v206_v57 }
  0xb5   :  { %v184_v11 = vmax.f32 %v152_v5, 0.0  ;;  %v200_v5 = vrot.slane %v199_v59, 1 }
  0xb7   :  { %v209_v20 = vadd.f32 %v184_v11, %v183_v10  ;;  %v234_v10 = vadd.f32 %v233_v63, %v232_v54  ;;  %v201_v17 = vadd.f32 %v200_v5, %v199_v59 }
  0xb8   :  { %v171_v24 = vpop.f32.mrf.mxu3 }
  0xb9   :  { %v210_v31 = vrot.slane %v209_v20, 4  ;;  %v172_v32 = vadd.f32 %v679_v30, %v171_v24  ;;  %v235_v21 = vrot.slane %v234_v10, 1  ;;  %v252_v24 = vpack.c.bf16 %v208_v13, %v208_v13 }
  0xba   :  { %v154_v35 = vpop.f32.mrf.mxu0  ;;  %v251_v27 = vpack.c.bf16 %v201_v17, %v201_v17 }
  0xbb   :  { %v192_v41 = vmax.f32 %v172_v32, 0.0  ;;  %v211_v43 = vadd.f32 %v210_v31, %v209_v20  ;;  %v155_v55 = vadd.f32 %v679_v30, %v154_v35  ;;  %v236_v32 = vadd.f32 %v235_v21, %v234_v10 }
  0xbc   :  { %v290_v34 = vunpack.c.l.b16 %v252_v24  ;;  %v289_v37 = vunpack.c.l.b16 %v251_v27 }
  0xbd   :  { %v237_v47 = vadd.f32 %v192_v41, %v191_v40  ;;  %v212_v51 = vrot.slane %v211_v43, 2  ;;  %v185_v0 = vmax.f32 %v155_v55, 0.0  ;;  %v256_v41 = vpack.c.bf16 %v236_v32, %v236_v32 }
  0xbe   :  { %v298_v44 = vsel %vm297_vm1, %v290_v34, %v289_v37 }
  0xbf   :  { %v238_v52 = vrot.slane %v237_v47, 4  ;;  %v213_v61 = vadd.f32 %v212_v51, %v211_v43  ;;  %v294_v50 = vunpack.c.l.b16 %v256_v41 }
  0xc0   :  { %v174_v53 = vpop.f32.mrf.mxu3 }
  0xc1   :  { %v239_v62 = vadd.f32 %v238_v52, %v237_v47  ;;  %v175_v3 = vadd.f32 %v679_v30, %v174_v53  ;;  %v214_v7 = vrot.slane %v213_v61, 1  ;;  %v293_v47 = vunpack.c.l.b16 %v255_v38 }
  0xc2   :  { %v156_v56 = vpop.f32.mrf.mxu0 }
  0xc3   :  { %v157_v58 = vadd.f32 %v679_v30, %v156_v56  ;;  %v240_v8 = vrot.slane %v239_v62, 2  ;;  %v193_v14 = vmax.f32 %v175_v3, 0.0  ;;  %v215_v19 = vadd.f32 %v214_v7, %v213_v61  ;;  %v275_v61 = vld [vmem:[%s782_s4] sm:$0x3] }
  0xc4   :  { %v278_v2 = vperm.slane %v275_v61, 1 }
  0xc5   :  { %v186_v1 = vmax.f32 %v157_v58, 0.0  ;;  %v241_v20 = vadd.f32 %v240_v8, %v239_v62  ;;  %v253_v29 = vpack.c.bf16 %v215_v19, %v215_v19  ;;  %v277_v62 = vperm.slane %v275_v61, 0 }
  0xc7   :  { %v216_v4 = vadd.f32 %v186_v1, %v185_v0  ;;  %v242_v31 = vrot.slane %v241_v20, 1  ;;  %v291_v39 = vunpack.c.l.b16 %v253_v29 }
  0xc8   :  { %v176_v9 = vpop.f32.mrf.mxu3 }
  0xc9   :  { %v217_v11 = vrot.slane %v216_v4, 4  ;;  %v177_v12 = vadd.f32 %v679_v30, %v176_v9  ;;  %v243_v40 = vadd.f32 %v242_v31, %v241_v20  ;;  %v300_v49 = vsel %vm299_vm2, %v291_v39, %v298_v44 }
  0xcb   :  { %v218_v15 = vadd.f32 %v217_v11, %v216_v4  ;;  %v194_v16 = vmax.f32 %v177_v12, 0.0  ;;  %v257_v48 = vpack.c.bf16 %v243_v40, %v243_v40 }
  0xcd   :  { %v219_v22 = vrot.slane %v218_v15, 2  ;;  %v244_v23 = vadd.f32 %v194_v16, %v193_v14  ;;  %v295_v56 = vunpack.c.l.b16 %v257_v48 }
  0xcf   :  { %v220_v25 = vadd.f32 %v219_v22, %v218_v15  ;;  %v245_v26 = vrot.slane %v244_v23, 4 }
  0xd1   :  { %v221_v30 = vrot.slane %v220_v25, 1  ;;  %v246_v33 = vadd.f32 %v245_v26, %v244_v23 }
  0xd3   :  { %v222_v35 = vadd.f32 %v221_v30, %v220_v25  ;;  %v247_v36 = vrot.slane %v246_v33, 2 }
  0xd5   :  { %v254_v42 = vpack.c.bf16 %v222_v35, %v222_v35  ;;  %v248_v43 = vadd.f32 %v247_v36, %v246_v33 }
  0xd7   :  { %v292_v45 = vunpack.c.l.b16 %v254_v42  ;;  %v249_v46 = vrot.slane %v248_v43, 1 }
  0xd9   :  { %v250_v51 = vadd.f32 %v249_v46, %v248_v43  ;;  %v302_v52 = vsel %vm301_vm3, %v292_v45, %v300_v49 }
  0xda   :  { %v304_v53 = vsel %vm303_vm4, %v293_v47, %v302_v52 }
  0xdb   :  { %v258_v54 = vpack.c.bf16 %v250_v51, %v250_v51  ;;  %v306_v55 = vsel %vm305_vm5, %v294_v50, %v304_v53 }
  0xdc   :  { %v308_v58 = vsel %vm307_vm6, %v295_v56, %v306_v55 }
  0xdd   :  { %v296_v57 = vunpack.c.l.b16 %v258_v54 }
  0xdf   :  { %v310_v59 = vsel %vm309_vm7, %v296_v57, %v308_v58 }
  0xe0   :  { %v311_v60 = vpack.c.b16 %v310_v59, %v310_v59 }
  0xe2   :  { %401 = vmatmul.bf16.vlgmr.msra.gmra.mxu1 %v311_v60  ;;  %414 = vmatmul.bf16.vlgmr.msra.gmra.mxu2 %v311_v60 }
 0x15f   :  { %v402_v63 = vpop.f32.mrf.mxu1 }
 0x160   :  { %v403_v0 = vadd.f32 %v402_v63, %v277_v62 }
 0x162   :  { %v419_v1 = vmul.f32 %v403_v0, %v403_v0 }
 0x164   :  { %420 = vadd.xlane.f32.xlu0 %v419_v1 }
 0x165   :  { %v415_v3 = vpop.f32.mrf.mxu2 }
 0x166   :  { %v416_v4 = vadd.f32 %v415_v3, %v278_v2 }
 0x167   :  { %v404_v5 = vpop.f32.mrf.mxu1 }
 0x168   :  { %435 = vst [vmem:[%s783_s5 + $0x8] sm:$0xff] %v416_v4 }
 0x16d   :  { %v417_v6 = vpop.f32.mrf.mxu2 }
 0x1d7   :  { %v421_v7 = vpop.xlane.xlu0 %420 }
 0x1d8   :  { %v422_v8 = vmax.f32 %v421_v7, 1e-24 }
 0x1da   :  { %587 = vrsqrt.f32 %v422_v8  ;;  %vm429_vm9 = vweird.f32 %v422_v8 }
 0x1e0   :  { %v588_v9 = vpop.eup %587 }
 0x1e1   :  { %v424_v10 = vmul.f32 %v588_v9, %v422_v8  ;;  %vm430_vm8 = vweird.f32 %v588_v9 }
 0x1e2   :  { %vm431_vm10 = vmor %vm429_vm9, %vm430_vm8 }
 0x1e3   :  { %v425_v11 = vmul.f32 %v588_v9, %v424_v10 }
 0x1e5   :  { %v426_v12 = vmul.f32 0.5, %v425_v11 }
 0x1e7   :  { %v427_v13 = vsub.f32 1.5, %v426_v12 }
 0x1e9   :  { %v428_v14 = vmul.f32 %v588_v9, %v427_v13 }
 0x1eb   :  { %v432_v15 = vsel %vm431_vm10, %v588_v9, %v428_v14 }
 0x1ec   :  { %v433_v16 = vmul.f32 %v432_v15, %v403_v0 }
 0x1ee   :  { %434 = vst [vmem:[%s783_s5] sm:$0xff] %v433_v16 }

</bundles_post_ra>
